<compile_context>
chip_gen: v7x
topology: tpu7x:2x2x1
jax: 0.10.0
libtpu: 0.0.40
codegen_flags: <defaults>
</compile_context>

<pallas_src>
import functools

import numpy as np
import jax
import jax.numpy as jnp
from jax.experimental import pallas as pl
from jax.experimental.pallas import tpu as pltpu


# ----------------------------- Pallas kernel --------------------------------

def _copy_kernel(x_ref, o_ref):
    # The view itself carries no compute; one full-tile VMEM load + store.
    o_ref[...] = x_ref[...]


# ------------------------------ helpers --------------------------------------

def _resolve_size(numel, size):
    """Resolve a torch-style view size (with at most one -1) to a concrete shape."""
    size = tuple(int(s) for s in size)
    if -1 in size:
        neg = size.index(-1)
        rest = 1
        for j, s in enumerate(size):
            if j != neg:
                rest *= s
        assert rest > 0 and numel % rest == 0, (numel, size)
        size = size[:neg] + (numel // rest,) + size[neg + 1:]
    assert int(np.prod(size)) == numel, (numel, size)
    return size


def _factor_lane_dense(numel):
    """Factor numel into (rows, cols) with cols a large multiple of 128 if possible."""
    for c in (4096, 2048, 1024, 512, 256, 128):
        if numel % c == 0:
            return numel // c, c
    # numel not divisible by 128: largest divisor <= 2048 (keeps sublane use,
    # stores may be masked but the whole array never has to sit in VMEM).
    for c in range(min(2048, numel), 0, -1):
        if numel % c == 0:
            return numel // c, c
    return 1, numel  # unreachable


# ------------------------------ wrapper --------------------------------------

def pallas_view(x, size, *, materialize=True):
    """Equivalent of torch `tensor.view(size)` (row-major contiguous view)."""
    numel = int(x.size)
    out_shape_final = _resolve_size(numel, size)

    if not materialize:
        # torch .view() is metadata-only; XLA reshape of a contiguous array is
        # free. This is the recommended path when no copy is required.
        return jnp.reshape(x, out_shape_final)

    itemsize = jnp.dtype(x.dtype).itemsize
    rows, cols = _factor_lane_dense(numel)
    x2 = x.reshape(rows, cols)  # free metadata reshape outside the kernel

    # ~4 MiB blocks: big enough to amortize per-step overhead on v7x's 3.2 TB/s
    # HBM; 4 double-buffered copies (input + output) total ~16 MiB, under the
    # 16/32/32 MiB scoped defaults and v7x's 64 MiB physical VMEM.
    target_block_bytes = 4 << 20
    tile = (target_block_bytes // max(1, cols * itemsize)) // 8 * 8
    tile = max(8, min(rows, tile))

    cost = pl.CostEstimate(flops=0, transcendentals=0,
                           bytes_accessed=2 * numel * itemsize)

    if rows > tile:
        # Tiled, pipelined streaming copy. Ragged last block handled by cdiv.
        out2 = pl.pallas_call(
            _copy_kernel,
            out_shape=jax.ShapeDtypeStruct((rows, cols), x.dtype),
            grid=(pl.cdiv(rows, tile),),
            in_specs=[pl.BlockSpec((tile, cols), lambda i: (i, 0))],
            out_specs=pl.BlockSpec((tile, cols), lambda i: (i, 0)),
            compiler_params=pltpu.CompilerParams(
                dimension_semantics=("parallel",),
                vmem_limit_bytes=32 << 20),
            cost_estimate=cost,
        )(x2)
    else:
        # Small case (whole payload <= ~4 MiB): single launch, whole-array block.
        out2 = pl.pallas_call(
            _copy_kernel,
            out_shape=jax.ShapeDtypeStruct((rows, cols), x.dtype),
            in_specs=[pl.BlockSpec((rows, cols), lambda: (0, 0))],
            out_specs=pl.BlockSpec((rows, cols), lambda: (0, 0)),
            cost_estimate=cost,
        )(x2)

    # Final shape change is metadata-only.
    return out2.reshape(out_shape_final)


class View:
    """Mirror of the PyTorch module: View(size)(tensor) == tensor.view(size)."""

    def __init__(self, size, materialize=True):
        self.size = size
        self.materialize = materialize

    def __call__(self, tensor):
        return pallas_view(tensor, self.size, materialize=self.materialize)


# ----------------------------------- main ------------------------------------

if __name__ == "__main__":
    key = jax.random.PRNGKey(0)

    # 1) Small shape consistent with the module's typical use (flatten spatial dims).
    B, C, H, W = 2, 4, 16, 16
    x = jax.random.normal(key, (B, C, H, W), dtype=jnp.float32)
    target_size = (-1, 256)  # (2, 4, 16, 16) -> (8, 256)

    fwd = jax.jit(functools.partial(pallas_view, size=target_size))
    out = fwd(x)
    jax.block_until_ready(out)

    ref = jnp.reshape(x, (8, 256))
    assert out.shape == ref.shape and out.dtype == x.dtype
    np.testing.assert_array_equal(np.asarray(out), np.asarray(ref))

    # Class wrapper (eager materializing path).
    out2 = View(target_size)(x)
    jax.block_until_ready(out2)
    np.testing.assert_array_equal(np.asarray(out2), np.asarray(ref))

    # Metadata-only (true torch-.view-like) path.
    out3 = View(target_size, materialize=False)(x)
    jax.block_until_ready(out3)
    np.testing.assert_array_equal(np.asarray(out3), np.asarray(ref))

    # 2) Medium shape to exercise the tiled/pipelined path (ragged grid: 520 rows).
    y = jax.random.normal(key, (8, 4, 260, 256), dtype=jnp.float32)  # 8.1 MiB
    outy = jax.jit(functools.partial(pallas_view, size=(32, -1)))(y)
    jax.block_until_ready(outy)
    np.testing.assert_array_equal(np.asarray(outy), np.asarray(jnp.reshape(y, (32, -1))))

    # 3) numel not divisible by 128 (fallback factorization).
    z = jax.random.normal(key, (2, 3, 5, 7), dtype=jnp.float32)
    outz = pallas_view(z, (6, 35))
    jax.block_until_ready(outz)
    np.testing.assert_array_equal(np.asarray(outz), np.asarray(jnp.reshape(z, (6, 35))))

    print("KERNEL_OK")
</pallas_src>

<mosaic_0001>
module attributes {stable_mosaic.version = 11 : i64} {
  func.func @_copy_kernel(%arg0: memref<1x2048xf32, #tpu.memory_space<vmem>>, %arg1: memref<1x2048xf32, #tpu.memory_space<vmem>>) attributes {dimension_semantics = [], scalar_prefetch = 0 : i64, scratch_operands = 0 : i64, tpu.core_type = #tpu.core_type<tc>} {
    %c0 = arith.constant 0 : index
    %c0_0 = arith.constant 0 : index
    %0 = vector.load %arg0[%c0, %c0_0] : memref<1x2048xf32, #tpu.memory_space<vmem>>, vector<1x2048xf32>
    %c0_1 = arith.constant 0 : index
    %c0_2 = arith.constant 0 : index
    %1 = vector.load %arg1[%c0_1, %c0_2] : memref<1x2048xf32, #tpu.memory_space<vmem>>, vector<1x2048xf32>
    tpu.vector_store %arg1[%c0_1, %c0_2], %0 {strides = array<i32>} : memref<1x2048xf32, #tpu.memory_space<vmem>>, vector<1x2048xf32>,
    return
  }
}

</mosaic_0001>

<bundles_post_ra>
// kernel: pallas_view.1
= control target key start
LH: loop header
LB: loop body
LE: loop exit
PB: predicated region body
PF: predicated region fallthrough
CT: control target
= control target key end

     0   :  { %s38_s0 = inlined_call_operand.vmem [shape: f32[1,2048], index: 0, kind: input, shape index: {}]   ;;  %s39_s1 = inlined_call_operand.vmem [shape: f32[1,2048], index: 1, kind: output, shape index: {}]  }
   0x1   :  { %v8_v0 = vld [vmem:[%s38_s0] sm:$0xff]  ;;  %v9_v1 = vld [vmem:[%s38_s0 + $0x8] sm:$0xff] }
   0x2   :  { %10 = vst [vmem:[%s39_s1] sm:$0xff] %v8_v0  ;;  %11 = vst [vmem:[%s39_s1 + $0x8] sm:$0xff] %v9_v1 }

</bundles_post_ra>
